<compile_context>
chip_gen: v5e
topology: v5e:2x2
jax: 0.10.0
libtpu: 0.0.40
codegen_flags: <defaults>
</compile_context>

<pallas_src>
import functools

import jax
import jax.numpy as jnp
from jax.experimental import pallas as pl
from jax.experimental.pallas import tpu as pltpu

BN_EPS = 1e-5


def _round_up(v, m):
    return ((v + m - 1) // m) * m


def _pick_tile(total, target):
    # `total` is a multiple of 128; largest multiple of 128 <= target dividing total.
    t = min(total, max(128, target))
    while total % t:
        t -= 128
    return t


def _vmem_capacity_bytes():
    try:
        return int(pltpu.get_tpu_info().vmem_capacity_bytes)
    except Exception:
        return 64 * 1024 * 1024          # conservative (v7x-sized) fallback


def _vmem_estimate(n_pad, dim_pad, hidden_pad, th, tp, use_cache):
    vmem = n_pad * dim_pad * 2           # x, bf16, single-buffered (Buffered(1))
    vmem += 2 * dim_pad * th * 2         # w1 tile, bf16, double-buffered
    vmem += 2 * th * tp * 2              # w2 tile, bf16, double-buffered
    vmem += 2 * n_pad * tp * 4           # f32 output block, double-buffered
    vmem += 2 * 2 * th * 4 + 2 * tp * 4  # gamma / beta / b2 rows (tiny)
    if use_cache:
        vmem += n_pad * hidden_pad * 2   # persistent bf16 h_act cache
    return vmem


def mlp_kernel(x_ref, w1_ref, g_ref, b_ref, w2_ref, b2_ref, o_ref, h_ref=None,
               *, n_valid, use_cache, mxu_stats):
    j = pl.program_id(0)                 # output-feature tile
    k = pl.program_id(1)                 # hidden (reduction) tile

    @pl.when(k == 0)
    def _init():
        o_ref[...] = jnp.zeros_like(o_ref)

    def _h_act_tile():
        # ---- Linear 1 (bias folded away by training-mode BN); bf16 MXU, f32 acc.
        h = jnp.dot(x_ref[...], w1_ref[...], preferred_element_type=jnp.float32)

        # ---- BatchNorm1d (training): per-feature stats over the FULL batch.
        # Padded batch rows of h are exactly zero so they add nothing to the sums;
        # divide by the true batch size.
        inv_n = 1.0 / float(n_valid)
        if mxu_stats:
            # Batch sums on the MXU (ones-row matmuls) instead of sublane VALU/XLU
            # reductions: the BN epilogue is the binding VLIW slot for small dim.
            ones = jnp.ones((1, h.shape[0]), jnp.float32)
            s1 = jnp.dot(ones, h, preferred_element_type=jnp.float32)
            s2 = jnp.dot(ones, h * h, preferred_element_type=jnp.float32)
        else:
            s1 = jnp.sum(h, axis=0, keepdims=True)
            s2 = jnp.sum(h * h, axis=0, keepdims=True)
        mean = s1 * inv_n
        var = jnp.maximum(s2 * inv_n - mean * mean, 0.0)     # guard tiny cancellation
        scale = g_ref[...] * jax.lax.rsqrt(var + BN_EPS)     # gamma folded into scale
        shift = b_ref[...] - mean * scale
        return jnp.maximum(h * scale + shift, 0.0).astype(jnp.bfloat16)   # ReLU -> bf16

    if use_cache:
        # Fill the persistent hidden-activation cache on the first output tile and
        # reuse it for all later output tiles (no matmul-1 / BN recomputation).
        @pl.when(j == 0)
        def _fill():
            h_ref[k] = _h_act_tile()
        h_act = h_ref[k]
    else:
        h_act = _h_act_tile()

    # ---- Linear 2: accumulate directly into the resident f32 output block.
    o_ref[...] += jnp.dot(h_act, w2_ref[...], preferred_element_type=jnp.float32)

    @pl.when(k == pl.num_programs(1) - 1)
    def _finalize():
        o_ref[...] += b2_ref[...]


def prepare_params(w1, gamma, beta, w2, b2):
    """One-time pad + bf16 cast of the weights (hoisted out of the per-call forward)."""
    dim, hidden = w1.shape
    proj = w2.shape[1]
    dim_pad, hidden_pad, proj_pad = (_round_up(d, 128) for d in (dim, hidden, proj))
    w1p = jnp.zeros((dim_pad, hidden_pad), jnp.float32).at[:dim, :hidden].set(w1).astype(jnp.bfloat16)
    w2p = jnp.zeros((hidden_pad, proj_pad), jnp.float32).at[:hidden, :proj].set(w2).astype(jnp.bfloat16)
    gp = jnp.zeros((1, hidden_pad), jnp.float32).at[:, :hidden].set(gamma)
    bp = jnp.zeros((1, hidden_pad), jnp.float32).at[:, :hidden].set(beta)
    b2p = jnp.zeros((1, proj_pad), jnp.float32).at[:, :proj].set(b2)
    return dict(w1=w1p, gamma=gp, beta=bp, w2=w2p, b2=b2p, dims=(dim, hidden, proj))


def mlp_forward(x, params):
    dim, hidden, proj = params["dims"]
    w1p, gp, bp = params["w1"], params["gamma"], params["beta"]
    w2p, b2p = params["w2"], params["b2"]
    dim_pad, hidden_pad = w1p.shape
    proj_pad = w2p.shape[1]

    N = x.shape[0]
    n_pad = _round_up(max(N, 16), 16)    # bf16 vreg holds [16, 128] sublanes
    xp = jnp.zeros((n_pad, dim_pad), jnp.float32).at[:N, :dim].set(x).astype(jnp.bfloat16)

    # --- Per-generation VMEM budget / tile targets (v5e & v6e: 128 MiB, v7x: 64 MiB).
    cap = _vmem_capacity_bytes()
    budget = cap * 3 // 4
    if cap >= 100 * (1 << 20):
        th_target, tp_target = 2048, 512     # v5e / v6e: spend the larger VMEM on TH
    else:
        th_target, tp_target = 1024, 256     # v7x: tighter budget

    TH = _pick_tile(hidden_pad, th_target)

    def fits(th, tp, cache):
        return _vmem_estimate(n_pad, dim_pad, hidden_pad, th, tp, cache) <= budget

    # Prefer a single output tile: zero recomputation, no cache, simplest pipeline.
    if fits(TH, proj_pad, False):
        TP, use_cache = proj_pad, False
    else:
        TP = _pick_tile(proj_pad, tp_target)
        use_cache = (proj_pad > TP) and fits(TH, TP, True)
    while not fits(TH, TP, use_cache) and TH > 128:
        TH = _pick_tile(hidden_pad, TH // 2)
    # TODO(synk): for batches too large for a VMEM-resident x (+ h_act cache), switch
    # to a two-pass BN (stats pass over batch tiles, then a normalize+matmul pass).

    nj, nk = proj_pad // TP, hidden_pad // TH
    mxu_stats = (n_pad % 128 == 0)       # lane-aligned contraction for the ones-dots

    # With the h_act cache, the j == 0 fill must run before any other j on the same
    # core, so the j axis stays un-sharded ("arbitrary") in that mode.
    # TODO(synk): a v7x 2-TensorCore split of the cache path would need a batch split
    # with a cross-core BN-stats reduction (CMEM / VMEM_SHARED) instead of sharding j.
    dim_sem = ("arbitrary", "arbitrary") if use_cache else ("parallel", "arbitrary")

    recompute = 1 if (nj == 1 or use_cache) else nj
    flops = (2 * n_pad * dim_pad * hidden_pad * recompute        # x @ w1
             + 2 * n_pad * hidden_pad * proj_pad                 # h_act @ w2
             + 10 * n_pad * hidden_pad * recompute)              # stats + BN/ReLU epilogue
    bytes_accessed = (xp.size * 2                                # x DMA'd once (const index)
                      + w1p.size * 2 * (nj if nj > 1 else 1)     # w1 re-streamed per out tile
                      + w2p.size * 2
                      + 4 * (gp.size + bp.size) * (nj if nj > 1 else 1)
                      + 4 * b2p.size + 4 * n_pad * proj_pad)

    kernel = functools.partial(mlp_kernel, n_valid=N, use_cache=use_cache,
                               mxu_stats=mxu_stats)
    scratch_shapes = [pltpu.VMEM((nk, n_pad, TH), jnp.bfloat16)] if use_cache else []

    out = pl.pallas_call(
        kernel,
        out_shape=jax.ShapeDtypeStruct((n_pad, proj_pad), jnp.float32),
        grid_spec=pltpu.PrefetchScalarGridSpec(
            num_scalar_prefetch=0,
            grid=(nj, nk),
            in_specs=[
                # x: whole padded batch, VMEM-resident; constant block index means it
                # is DMA'd once, and Buffered(1) drops the dead second pipeline buffer.
                pl.BlockSpec((n_pad, dim_pad), lambda j, k: (0, 0),
                             pipeline_mode=pl.Buffered(1)),
                pl.BlockSpec((dim_pad, TH), lambda j, k: (0, k)),    # w1 tile
                pl.BlockSpec((1, TH), lambda j, k: (0, k)),          # gamma tile
                pl.BlockSpec((1, TH), lambda j, k: (0, k)),          # beta tile
                pl.BlockSpec((TH, TP), lambda j, k: (k, j)),         # w2 tile
                pl.BlockSpec((1, TP), lambda j, k: (0, j)),          # b2 tile
            ],
            out_specs=pl.BlockSpec((n_pad, TP), lambda j, k: (0, j)),
            scratch_shapes=scratch_shapes,
        ),
        compiler_params=pltpu.CompilerParams(
            dimension_semantics=dim_sem,
            vmem_limit_bytes=int(budget),
        ),
        cost_estimate=pl.CostEstimate(
            flops=flops, transcendentals=hidden_pad * recompute,
            bytes_accessed=bytes_accessed),
    )(xp, w1p, gp, bp, w2p, b2p)

    return out[:N, :proj]


def reference_module_f32(x, w1, b1, gamma, beta, w2, b2):
    """Pure-f32 semantics of nn.Linear -> BatchNorm1d(train) -> ReLU -> nn.Linear."""
    h = x @ w1 + b1
    mean = jnp.mean(h, axis=0, keepdims=True)
    var = jnp.mean((h - mean) ** 2, axis=0, keepdims=True)
    h = (h - mean) / jnp.sqrt(var + BN_EPS) * gamma + beta
    h = jnp.maximum(h, 0.0)
    return h @ w2 + b2


def reference_bf16_mxu(x, w1, b1, gamma, beta, w2, b2):
    """Same math, but with the kernel's bf16-MXU operand rounding (f32 accumulation)."""
    h = jnp.dot(x.astype(jnp.bfloat16), w1.astype(jnp.bfloat16),
                preferred_element_type=jnp.float32) + b1
    mean = jnp.mean(h, axis=0, keepdims=True)
    var = jnp.mean((h - mean) ** 2, axis=0, keepdims=True)
    h = (h - mean) * (gamma * jax.lax.rsqrt(var + BN_EPS)) + beta
    h = jnp.maximum(h, 0.0)
    return jnp.dot(h.astype(jnp.bfloat16), w2.astype(jnp.bfloat16),
                   preferred_element_type=jnp.float32) + b2


if __name__ == "__main__":
    # Small shapes consistent with MLP(dim, hidden_size, projection_size).
    N, dim, hidden, proj = 64, 32, 64, 32

    key = jax.random.PRNGKey(0)
    kx, kw1, kb1, kg, kb, kw2, kb2 = jax.random.split(key, 7)

    x = jax.random.normal(kx, (N, dim), dtype=jnp.float32)

    lim1 = dim ** -0.5
    w1 = jax.random.uniform(kw1, (dim, hidden), minval=-lim1, maxval=lim1, dtype=jnp.float32)
    b1 = jax.random.uniform(kb1, (1, hidden), minval=-lim1, maxval=lim1, dtype=jnp.float32)

    # BatchNorm affine params (default init is gamma=1, beta=0; perturbed to exercise
    # the affine path).
    gamma = 1.0 + 0.1 * jax.random.normal(kg, (1, hidden), dtype=jnp.float32)
    beta = 0.1 * jax.random.normal(kb, (1, hidden), dtype=jnp.float32)

    lim2 = hidden ** -0.5
    w2 = jax.random.uniform(kw2, (hidden, proj), minval=-lim2, maxval=lim2, dtype=jnp.float32)
    b2 = jax.random.uniform(kb2, (1, proj), minval=-lim2, maxval=lim2, dtype=jnp.float32)

    params = prepare_params(w1, gamma, beta, w2, b2)   # one-time pad + bf16 cast
    out = jax.block_until_ready(mlp_forward(x, params))
    assert out.shape == (N, proj)

    # Tight check vs a reference with the same bf16-MXU rounding (includes b1, which
    # confirms that dropping the first bias under training-mode BN is exact).
    ref_bf16 = reference_bf16_mxu(x, w1, b1, gamma, beta, w2, b2)
    assert jnp.allclose(out, ref_bf16, atol=2e-3, rtol=2e-3), "mismatch vs bf16-matched reference"

    # Looser check vs the pure-f32 module semantics (difference is only bf16 operand rounding).
    ref_f32 = reference_module_f32(x, w1, b1, gamma, beta, w2, b2)
    assert jnp.allclose(out, ref_f32, atol=2e-2, rtol=2e-2), "mismatch vs f32 module reference"

    print("KERNEL_OK")
</pallas_src>

<mosaic_0001>
module attributes {stable_mosaic.version = 11 : i64} {
  func.func @mlp_kernel(%arg0: i32, %arg1: i32, %arg2: memref<64x128xbf16, #tpu.memory_space<vmem>>, %arg3: memref<128x128xbf16, #tpu.memory_space<vmem>>, %arg4: memref<1x128xf32, #tpu.memory_space<vmem>>, %arg5: memref<1x128xf32, #tpu.memory_space<vmem>>, %arg6: memref<128x128xbf16, #tpu.memory_space<vmem>>, %arg7: memref<1x128xf32, #tpu.memory_space<vmem>>, %arg8: memref<64x128xf32, #tpu.memory_space<vmem>>) attributes {dimension_semantics = [#tpu.dimension_semantics<parallel>, #tpu.dimension_semantics<arbitrary>], iteration_bounds = array<i64: 1, 1>, scalar_prefetch = 0 : i64, scratch_operands = 0 : i64, tpu.core_type = #tpu.core_type<tc>, window_params = [{pipeline_mode = #tpu.pipeline_mode<synchronous>, transform_indices = @transform_0, window_bounds = array<i64: 64, 128>}, {transform_indices = @transform_1, window_bounds = array<i64: 128, 128>}, {transform_indices = @transform_2, window_bounds = array<i64: 1, 128>}, {transform_indices = @transform_3, window_bounds = array<i64: 1, 128>}, {transform_indices = @transform_4, window_bounds = array<i64: 128, 128>}, {transform_indices = @transform_5, window_bounds = array<i64: 1, 128>}, {transform_indices = @transform_6, window_bounds = array<i64: 64, 128>}]} {
    %c0_i32 = arith.constant 0 : i32
    %0 = arith.cmpi eq, %arg1, %c0_i32 : i32
    %1 = arith.extui %0 : i1 to i32
    %c0_i32_0 = arith.constant 0 : i32
    %2 = arith.cmpi ne, %1, %c0_i32_0 : i32
    scf.if %2 {
      %cst_24 = arith.constant 0.000000e+00 : f32
      %42 = vector.broadcast %cst_24 : f32 to vector<64x128xf32>
      %c0_25 = arith.constant 0 : index
      %c0_26 = arith.constant 0 : index
      %43 = vector.load %arg8[%c0_25, %c0_26] : memref<64x128xf32, #tpu.memory_space<vmem>>, vector<64x128xf32>
      tpu.vector_store %arg8[%c0_25, %c0_26], %42 {strides = array<i32>} : memref<64x128xf32, #tpu.memory_space<vmem>>, vector<64x128xf32>,
    } else {
    }
    %c0 = arith.constant 0 : index
    %c0_1 = arith.constant 0 : index
    %3 = vector.load %arg2[%c0, %c0_1] : memref<64x128xbf16, #tpu.memory_space<vmem>>, vector<64x128xbf16>
    %c0_2 = arith.constant 0 : index
    %c0_3 = arith.constant 0 : index
    %4 = vector.load %arg3[%c0_2, %c0_3] : memref<128x128xbf16, #tpu.memory_space<vmem>>, vector<128x128xbf16>
    %cst = arith.constant dense<0.000000e+00> : vector<64x128xf32>
    %5 = tpu.matmul %3, %4, %cst {dimension_numbers = #tpu.dot_dimension_numbers<[1], [0], [0], [1], [0, 0, 1, 1], [], []>} : vector<64x128xbf16>, vector<128x128xbf16>, vector<64x128xf32> -> vector<64x128xf32>
    %cst_4 = arith.constant dense<0.000000e+00> : vector<128xf32>
    %6 = vector.multi_reduction <add>, %5, %cst_4 [0] : vector<64x128xf32> to vector<128xf32>
    %7 = vector.shape_cast %6 : vector<128xf32> to vector<1x128xf32>
    %8 = arith.mulf %5, %5 : vector<64x128xf32>
    %cst_5 = arith.constant dense<0.000000e+00> : vector<128xf32>
    %9 = vector.multi_reduction <add>, %8, %cst_5 [0] : vector<64x128xf32> to vector<128xf32>
    %10 = vector.shape_cast %9 : vector<128xf32> to vector<1x128xf32>
    %cst_6 = arith.constant 1.562500e-02 : f32
    %11 = vector.broadcast %cst_6 : f32 to vector<1x128xf32>
    %12 = arith.mulf %7, %11 : vector<1x128xf32>
    %cst_7 = arith.constant 1.562500e-02 : f32
    %13 = vector.broadcast %cst_7 : f32 to vector<1x128xf32>
    %14 = arith.mulf %10, %13 : vector<1x128xf32>
    %15 = arith.mulf %12, %12 : vector<1x128xf32>
    %16 = arith.subf %14, %15 : vector<1x128xf32>
    %cst_8 = arith.constant 0.000000e+00 : f32
    %17 = vector.broadcast %cst_8 : f32 to vector<1x128xf32>
    %18 = arith.maximumf %16, %17 : vector<1x128xf32>
    %c0_9 = arith.constant 0 : index
    %c0_10 = arith.constant 0 : index
    %19 = vector.load %arg4[%c0_9, %c0_10] : memref<1x128xf32, #tpu.memory_space<vmem>>, vector<1x128xf32>
    %cst_11 = arith.constant 9.99999974E-6 : f32
    %20 = vector.broadcast %cst_11 : f32 to vector<1x128xf32>
    %21 = arith.addf %18, %20 : vector<1x128xf32>
    %22 = math.rsqrt %21 : vector<1x128xf32>
    %23 = arith.mulf %19, %22 : vector<1x128xf32>
    %c0_12 = arith.constant 0 : index
    %c0_13 = arith.constant 0 : index
    %24 = vector.load %arg5[%c0_12, %c0_13] : memref<1x128xf32, #tpu.memory_space<vmem>>, vector<1x128xf32>
    %25 = arith.mulf %12, %23 : vector<1x128xf32>
    %26 = arith.subf %24, %25 : vector<1x128xf32>
    %27 = vector.broadcast %23 : vector<1x128xf32> to vector<64x128xf32>
    %28 = arith.mulf %5, %27 : vector<64x128xf32>
    %29 = vector.broadcast %26 : vector<1x128xf32> to vector<64x128xf32>
    %30 = arith.addf %28, %29 : vector<64x128xf32>
    %cst_14 = arith.constant 0.000000e+00 : f32
    %31 = vector.broadcast %cst_14 : f32 to vector<64x128xf32>
    %32 = arith.maximumf %30, %31 : vector<64x128xf32>
    %33 = arith.truncf %32 : vector<64x128xf32> to vector<64x128xbf16>
    %c0_15 = arith.constant 0 : index
    %c0_16 = arith.constant 0 : index
    %34 = vector.load %arg8[%c0_15, %c0_16] : memref<64x128xf32, #tpu.memory_space<vmem>>, vector<64x128xf32>
    %c0_17 = arith.constant 0 : index
    %c0_18 = arith.constant 0 : index
    %35 = vector.load %arg6[%c0_17, %c0_18] : memref<128x128xbf16, #tpu.memory_space<vmem>>, vector<128x128xbf16>
    %cst_19 = arith.constant dense<0.000000e+00> : vector<64x128xf32>
    %36 = tpu.matmul %33, %35, %cst_19 {dimension_numbers = #tpu.dot_dimension_numbers<[1], [0], [0], [1], [0, 0, 1, 1], [], []>} : vector<64x128xbf16>, vector<128x128xbf16>, vector<64x128xf32> -> vector<64x128xf32>
    %37 = arith.addf %34, %36 : vector<64x128xf32>
    %c0_20 = arith.constant 0 : index
    %c0_21 = arith.constant 0 : index
    %38 = vector.load %arg8[%c0_20, %c0_21] : memref<64x128xf32, #tpu.memory_space<vmem>>, vector<64x128xf32>
    tpu.vector_store %arg8[%c0_20, %c0_21], %37 {strides = array<i32>} : memref<64x128xf32, #tpu.memory_space<vmem>>, vector<64x128xf32>,
    %c0_i32_22 = arith.constant 0 : i32
    %39 = arith.cmpi eq, %arg1, %c0_i32_22 : i32
    %40 = arith.extui %39 : i1 to i32
    %c0_i32_23 = arith.constant 0 : i32
    %41 = arith.cmpi ne, %40, %c0_i32_23 : i32
    scf.if %41 {
      %c0_24 = arith.constant 0 : index
      %c0_25 = arith.constant 0 : index
      %42 = vector.load %arg8[%c0_24, %c0_25] : memref<64x128xf32, #tpu.memory_space<vmem>>, vector<64x128xf32>
      %c0_26 = arith.constant 0 : index
      %c0_27 = arith.constant 0 : index
      %43 = vector.load %arg7[%c0_26, %c0_27] : memref<1x128xf32, #tpu.memory_space<vmem>>, vector<1x128xf32>
      %44 = vector.broadcast %43 : vector<1x128xf32> to vector<64x128xf32>
      %45 = arith.addf %42, %44 : vector<64x128xf32>
      %c0_28 = arith.constant 0 : index
      %c0_29 = arith.constant 0 : index
      %46 = vector.load %arg8[%c0_28, %c0_29] : memref<64x128xf32, #tpu.memory_space<vmem>>, vector<64x128xf32>
      tpu.vector_store %arg8[%c0_28, %c0_29], %45 {strides = array<i32>} : memref<64x128xf32, #tpu.memory_space<vmem>>, vector<64x128xf32>,
    } else {
    }
    return
  }
  func.func @transform_0(%arg0: i32, %arg1: i32) -> (i32, i32) {
    %c0_i32 = arith.constant 0 : i32
    %c0_i32_0 = arith.constant 0 : i32
    %c0_i32_1 = arith.constant 0 : i32
    return %c0_i32, %c0_i32_0 : i32, i32
  }
  func.func @transform_1(%arg0: i32, %arg1: i32) -> (i32, i32) {
    %c0_i32 = arith.constant 0 : i32
    %c0_i32_0 = arith.constant 0 : i32
    return %c0_i32, %arg1 : i32, i32
  }
  func.func @transform_2(%arg0: i32, %arg1: i32) -> (i32, i32) {
    %c0_i32 = arith.constant 0 : i32
    %c0_i32_0 = arith.constant 0 : i32
    return %c0_i32, %arg1 : i32, i32
  }
  func.func @transform_3(%arg0: i32, %arg1: i32) -> (i32, i32) {
    %c0_i32 = arith.constant 0 : i32
    %c0_i32_0 = arith.constant 0 : i32
    return %c0_i32, %arg1 : i32, i32
  }
  func.func @transform_4(%arg0: i32, %arg1: i32) -> (i32, i32) {
    %c0_i32 = arith.constant 0 : i32
    return %arg1, %arg0 : i32, i32
  }
  func.func @transform_5(%arg0: i32, %arg1: i32) -> (i32, i32) {
    %c0_i32 = arith.constant 0 : i32
    %c0_i32_0 = arith.constant 0 : i32
    return %c0_i32, %arg0 : i32, i32
  }
  func.func @transform_6(%arg0: i32, %arg1: i32) -> (i32, i32) {
    %c0_i32 = arith.constant 0 : i32
    %c0_i32_0 = arith.constant 0 : i32
    return %c0_i32, %arg0 : i32, i32
  }
}

</mosaic_0001>

<bundles_post_ra>
// kernel: tpu_custom_call.1
= control target key start
LH: loop header
LB: loop body
LE: loop exit
PB: predicated region body
PF: predicated region fallthrough
CT: control target
= control target key end

     0   :  { %11 = vsyncpa [#allocation3], 0  ;;  %s807_s0 = inlined_call_operand.hbm [shape: bf16[64,128], index: 0, kind: input, shape index: {}]   ;;  %s808_s1 = inlined_call_operand.hbm [shape: bf16[128,128], index: 1, kind: input, shape index: {}]   ;;  %s809_s2 = inlined_call_operand.vmem [shape: f32[1,128], index: 2, kind: input, shape index: {}]   ;;  %s810_s3 = inlined_call_operand.vmem [shape: f32[1,128], index: 3, kind: input, shape index: {}]   ;;  %s811_s4 = inlined_call_operand.hbm [shape: bf16[128,128], index: 4, kind: input, shape index: {}]   ;;  %s812_s5 = inlined_call_operand.vmem [shape: f32[1,128], index: 5, kind: input, shape index: {}]   ;;  %s813_s6 = inlined_call_operand.hbm [shape: f32[64,128], index: 6, kind: output, shape index: {}]  }
   0x1   :  { %12 = vsyncpa [#allocation6], 0 }
   0x2   :  { %13 = vsyncpa [#allocation4], 0  ;;  %s31_s23 = sshll.u32 %s808_s1, 4  ;;  %s695_s24 = smov [#allocation5]   ;;  %s32_s23 = int_to_ptr.hbm [resolvable:$true] %s31_s23 }
   0x3   :  { %s33_s25 = sshll.u32 %s695_s24, 4  ;;  %s18_s28 = sshll.u32 %s807_s0, 4  ;;  %s34_s25 = int_to_ptr.vmem [resolvable:$true] %s33_s25  ;;  %s19_s28 = int_to_ptr.hbm [resolvable:$true] %s18_s28 }
   0x4   :  { %s696_s29 = smov 64   ;;  %s697_s30 = smov 4  }
   0x5   :  { %39 = dma.hbm_to_vmem [thread:$0]  %s32_s23, 1024, %s34_s25, [#allocation6], %s696_s29, %s696_s29, %s697_s30  }
   0x6   :  { %s698_s7 = smov [#allocation2]   ;;  %s48_s11 = sshll.u32 %s811_s4, 4  ;;  %s49_s11 = int_to_ptr.hbm [resolvable:$true] %s48_s11 }
   0x7   :  { %s20_s8 = sshll.u32 %s698_s7, 4  ;;  %s699_s1 = smov [#allocation7]   ;;  %s21_s8 = int_to_ptr.vmem [resolvable:$true] %s20_s8 }
   0x8   :  { %26 = dma.hbm_to_vmem [thread:$0]  %s19_s28, 512, %s21_s8, [#allocation3], %s696_s29, %s696_s29, %s697_s30  }
   0x9   :  { %s50_s12 = sshll.u32 %s699_s1, 4  ;;  %s51_s12 = int_to_ptr.vmem [resolvable:$true] %s50_s12 }
   0xa   :  { %56 = dma.hbm_to_vmem [thread:$0]  %s49_s11, 1024, %s51_s12, [#allocation6], %s696_s29, %s696_s29, %s697_s30  }
   0xb   :  { %689 = dma.done.wait [#allocation3], 512  }
   0xc   :  { %690 = vsyncadd [#allocation3], 4294966784 }
   0xd   :  { %691 = dma.done.wait [#allocation6], 2048  }
   0xe   :  { %692 = vsyncadd [#allocation6], 4294965248  ;;  %v556_v0 = vld [vmem:[#allocation5 + $0x38] sm:$0xff]  ;;  %v555_v1 = vld [vmem:[#allocation5 + $0x30] sm:$0xff]  ;;  %s451_s18 = sshll.u32 %s813_s6, 4  ;;  %s701_s19 = smov 128   ;;  %s452_s18 = int_to_ptr.hbm [resolvable:$true] %s451_s18 }
   0xf   :  { %179 = vmatpush.bf16.msra.mxu0 %v556_v0  ;;  %565 = vmatpush.bf16.msra.mxu2 %v556_v0  ;;  %v554_v2 = vld [vmem:[#allocation5 + $0x28] sm:$0xff]  ;;  %v553_v3 = vld [vmem:[#allocation5 + $0x20] sm:$0xff]  ;;  %v552_v4 = vld [vmem:[#allocation5 + $0x18] sm:$0xff]  ;;  %s702_s20 = smov 8  }
  0x10   :  { %v551_v5 = vld [vmem:[#allocation5 + $0x10] sm:$0xff]  ;;  %v550_v6 = vld [vmem:[#allocation5 + $0x8] sm:$0xff]  ;;  %v549_v7 = vld [vmem:[#allocation5] sm:$0xff] }
  0x11   :  { %v545_v8 = vld [vmem:[#allocation2] sm:$0xff]  ;;  %v547_v9 = vld [vmem:[#allocation2 + $0x10] sm:$0xff]  ;;  %v546_v10 = vld [vmem:[#allocation2 + $0x8] sm:$0xff] }
  0x12   :  { %v548_v11 = vld [vmem:[#allocation2 + $0x18] sm:$0xff]  ;;  %v563_v32 = vld [vmem:[#allocation7 + $0x30] sm:$0xff]  ;;  %v562_v40 = vld [vmem:[#allocation7 + $0x28] sm:$0xff] }
  0x13   :  { %180 = vmatpush.bf16.msra.mxu0 %v555_v1  ;;  %566 = vmatpush.bf16.msra.mxu2 %v555_v1  ;;  %v564_v25 = vld [vmem:[#allocation7 + $0x38] sm:$0xff]  ;;  %v561_v46 = vld [vmem:[#allocation7 + $0x20] sm:$0xff]  ;;  %v559_v56 = vld [vmem:[#allocation7 + $0x10] sm:$0xff] }
  0x14   :  { %369 = vmatpush.bf16.msra.mxu1 %v564_v25  ;;  %573 = vmatpush.bf16.msra.mxu3 %v564_v25  ;;  %v560_v51 = vld [vmem:[#allocation7 + $0x18] sm:$0xff]  ;;  %v558_v61 = vld [vmem:[#allocation7 + $0x8] sm:$0xff]  ;;  %v557_v1 = vld [vmem:[#allocation7] sm:$0xff] }
  0x17   :  { %181 = vmatpush.bf16.msra.mxu0 %v554_v2  ;;  %567 = vmatpush.bf16.msra.mxu2 %v554_v2 }
  0x18   :  { %370 = vmatpush.bf16.msra.mxu1 %v563_v32  ;;  %574 = vmatpush.bf16.msra.mxu3 %v563_v32 }
  0x1b   :  { %182 = vmatpush.bf16.msra.mxu0 %v553_v3  ;;  %568 = vmatpush.bf16.msra.mxu2 %v553_v3 }
  0x1c   :  { %371 = vmatpush.bf16.msra.mxu1 %v562_v40  ;;  %575 = vmatpush.bf16.msra.mxu3 %v562_v40 }
  0x1f   :  { %183 = vmatpush.bf16.msra.mxu0 %v552_v4  ;;  %569 = vmatpush.bf16.msra.mxu2 %v552_v4 }
  0x20   :  { %372 = vmatpush.bf16.msra.mxu1 %v561_v46  ;;  %576 = vmatpush.bf16.msra.mxu3 %v561_v46  ;;  %v590_v46 = vld [vmem:[%s812_s5] ss:$0 sm:$0xff]  ;;  %s700_s5 = smov [#allocation8]  }
  0x21   :  { %s449_s15 = sshll.u32 %s700_s5, 4  ;;  %s450_s15 = int_to_ptr.vmem [resolvable:$true] %s449_s15 }
  0x23   :  { %184 = vmatpush.bf16.msra.mxu0 %v551_v5  ;;  %570 = vmatpush.bf16.msra.mxu2 %v551_v5 }
  0x24   :  { %373 = vmatpush.bf16.msra.mxu1 %v560_v51  ;;  %577 = vmatpush.bf16.msra.mxu3 %v560_v51 }
  0x27   :  { %185 = vmatpush.bf16.msra.mxu0 %v550_v6  ;;  %571 = vmatpush.bf16.msra.mxu2 %v550_v6 }
  0x28   :  { %374 = vmatpush.bf16.msra.mxu1 %v559_v56  ;;  %578 = vmatpush.bf16.msra.mxu3 %v559_v56 }
  0x2b   :  { %186 = vmatpush.bf16.msra.mxu0 %v549_v7  ;;  %572 = vmatpush.bf16.msra.mxu2 %v549_v7 }
  0x2c   :  { %375 = vmatpush.bf16.msra.mxu1 %v558_v61  ;;  %579 = vmatpush.bf16.msra.mxu3 %v558_v61 }
  0x2e   :  { %187 = vmatmul.bf16.vlgmr.msra.gmra.mxu0 %v545_v8  ;;  %197 = vmatmul.bf16.vlgmr.msra.gmra.mxu2 %v547_v9  ;;  %v247_v9 = vld [vmem:[%s809_s2] sm:$0x1] }
  0x30   :  { %376 = vmatpush.bf16.msra.mxu1 %v557_v1  ;;  %580 = vmatpush.bf16.msra.mxu3 %v557_v1 }
  0x3e   :  { %192 = vmatmul.bf16.gmra.mxu0 %v546_v10  ;;  %202 = vmatmul.bf16.gmra.mxu2 %v548_v11 }
  0xab   :  { %v747_v12 = vpop.f32.mrf.mxu0 }
  0xac   :  { %v221_v18 = vmul.f32 %v747_v12, %v747_v12 }
  0xb1   :  { %v749_v13 = vpop.f32.mrf.mxu2 }
  0xb2   :  { %v225_v29 = vmul.f32 %v749_v13, %v749_v13 }
  0xb3   :  { %v751_v14 = vpop.f32.mrf.mxu0 }
  0xb4   :  { %v222_v17 = vmul.f32 %v751_v14, %v751_v14  ;;  %v208_v19 = vadd.f32 %v751_v14, %v747_v12 }
  0xb6   :  { %v229_v22 = vadd.f32 %v222_v17, %v221_v18  ;;  %v260_v18 = vld [vmem:[%s810_s3] sm:$0x1] }
  0xb9   :  { %v753_v15 = vpop.f32.mrf.mxu2 }
  0xba   :  { %v226_v33 = vmul.f32 %v753_v15, %v753_v15 }
  0xbb   :  { %v755_v16 = vpop.f32.mrf.mxu0 }
  0xbc   :  { %v223_v20 = vmul.f32 %v755_v16, %v755_v16  ;;  %v209_v23 = vadd.f32 %v208_v19, %v755_v16 }
  0xbe   :  { %v230_v26 = vadd.f32 %v229_v22, %v223_v20 }
  0xc1   :  { %v765_v21 = vpop.f32.mrf.mxu2 }
  0xc2   :  { %v227_v37 = vmul.f32 %v765_v21, %v765_v21 }
  0xc3   :  { %v768_v24 = vpop.f32.mrf.mxu0 }
  0xc4   :  { %v210_v27 = vadd.f32 %v209_v23, %v768_v24  ;;  %v224_v28 = vmul.f32 %v768_v24, %v768_v24 }
  0xc6   :  { %v211_v30 = vadd.f32 %v210_v27, %v749_v13  ;;  %v231_v31 = vadd.f32 %v230_v26, %v224_v28 }
  0xc8   :  { %v232_v34 = vadd.f32 %v231_v31, %v225_v29  ;;  %v212_v35 = vadd.f32 %v211_v30, %v753_v15 }
  0xc9   :  { %v779_v36 = vpop.f32.mrf.mxu2 }
  0xca   :  { %v213_v38 = vadd.f32 %v212_v35, %v765_v21  ;;  %v233_v39 = vadd.f32 %v232_v34, %v226_v33  ;;  %v228_v42 = vmul.f32 %v779_v36, %v779_v36 }
  0xcc   :  { %v214_v41 = vadd.f32 %v213_v38, %v779_v36  ;;  %v234_v43 = vadd.f32 %v233_v39, %v227_v37 }
  0xce   :  { %v215_v44 = vrot.slane %v214_v41, 4  ;;  %v235_v45 = vadd.f32 %v234_v43, %v228_v42 }
  0xd0   :  { %v216_v47 = vadd.f32 %v215_v44, %v214_v41  ;;  %v236_v48 = vrot.slane %v235_v45, 4 }
  0xd2   :  { %v217_v49 = vrot.slane %v216_v47, 2  ;;  %v237_v50 = vadd.f32 %v236_v48, %v235_v45 }
  0xd4   :  { %v218_v52 = vadd.f32 %v217_v49, %v216_v47  ;;  %v238_v53 = vrot.slane %v237_v50, 2 }
  0xd6   :  { %v219_v54 = vrot.slane %v218_v52, 1  ;;  %v239_v55 = vadd.f32 %v238_v53, %v237_v50 }
  0xd8   :  { %v220_v57 = vadd.f32 %v219_v54, %v218_v52  ;;  %v240_v58 = vrot.slane %v239_v55, 1 }
  0xda   :  { %v241_v59 = vadd.f32 %v240_v58, %v239_v55  ;;  %v242_v60 = vmul.f32 0.015625, %v220_v57 }
  0xdc   :  { %v243_v62 = vmul.f32 0.015625, %v241_v59  ;;  %v244_v63 = vmul.f32 %v242_v60, %v242_v60 }
  0xde   :  { %v245_v0 = vsub.f32 %v243_v62, %v244_v63 }
  0xe0   :  { %v246_v2 = vmax.f32 %v245_v0, 0.0 }
  0xe2   :  { %v248_v3 = vadd.f32 1e-05, %v246_v2 }
  0xe4   :  { %591 = vrsqrt.f32 %v248_v3  ;;  %vm255_vm1 = vweird.f32 %v248_v3 }
  0xea   :  { %v592_v4 = vpop.eup %591 }
  0xeb   :  { %v250_v5 = vmul.f32 %v592_v4, %v248_v3  ;;  %vm256_vm0 = vweird.f32 %v592_v4 }
  0xec   :  { %vm257_vm2 = vmor %vm255_vm1, %vm256_vm0 }
  0xed   :  { %v251_v6 = vmul.f32 %v592_v4, %v250_v5 }
  0xef   :  { %v252_v7 = vmul.f32 0.5, %v251_v6 }
  0xf1   :  { %v253_v8 = vsub.f32 1.5, %v252_v7 }
  0xf3   :  { %v254_v10 = vmul.f32 %v592_v4, %v253_v8 }
  0xf5   :  { %v258_v11 = vsel %vm257_vm2, %v592_v4, %v254_v10 }
  0xf6   :  { %v259_v17 = vmul.f32 %v258_v11, %v247_v9 }
  0xf8   :  { %v261_v19 = vmul.f32 %v259_v17, %v242_v60  ;;  %v264_v20 = vperm.slane %v259_v17, 0 }
  0xfa   :  { %v262_v22 = vsub.f32 %v260_v18, %v261_v19  ;;  %v273_v23 = vmul.f32 %v264_v20, %v779_v36  ;;  %v266_v26 = vmul.f32 %v264_v20, %v747_v12  ;;  %v267_v27 = vmul.f32 %v264_v20, %v751_v14 }
  0xfb   :  { %v270_v28 = vmul.f32 %v264_v20, %v749_v13  ;;  %v271_v29 = vmul.f32 %v264_v20, %v753_v15  ;;  %v268_v30 = vmul.f32 %v264_v20, %v755_v16  ;;  %v269_v31 = vmul.f32 %v264_v20, %v768_v24 }
  0xfc   :  { %v275_v25 = vperm.slane %v262_v22, 0  ;;  %v272_v32 = vmul.f32 %v264_v20, %v765_v21 }
  0xfe   :  { %v284_v33 = vadd.f32 %v275_v25, %v273_v23  ;;  %v277_v34 = vadd.f32 %v275_v25, %v266_v26  ;;  %v278_v35 = vadd.f32 %v275_v25, %v267_v27  ;;  %v281_v37 = vadd.f32 %v275_v25, %v270_v28 }
  0xff   :  { %v282_v36 = vadd.f32 %v275_v25, %v271_v29  ;;  %v279_v38 = vadd.f32 %v275_v25, %v268_v30  ;;  %v280_v39 = vadd.f32 %v275_v25, %v269_v31  ;;  %v283_v12 = vadd.f32 %v275_v25, %v272_v32 }
 0x100   :  { %v285_v40 = vmax.f32 %v277_v34, 0.0  ;;  %v286_v14 = vmax.f32 %v278_v35, 0.0  ;;  %v289_v41 = vmax.f32 %v281_v37, 0.0  ;;  %v292_v13 = vmax.f32 %v284_v33, 0.0 }
 0x101   :  { %v290_v42 = vmax.f32 %v282_v36, 0.0  ;;  %v287_v15 = vmax.f32 %v279_v38, 0.0  ;;  %v288_v43 = vmax.f32 %v280_v39, 0.0  ;;  %v291_v16 = vmax.f32 %v283_v12, 0.0 }
 0x102   :  { %v293_v44 = vpack.c.bf16 %v286_v14, %v285_v40 }
 0x103   :  { %v295_v24 = vpack.c.bf16 %v290_v42, %v289_v41  ;;  %v294_v45 = vpack.c.bf16 %v288_v43, %v287_v15  ;;  %v296_v21 = vpack.c.bf16 %v292_v13, %v291_v16 }
 0x104   :  { %377 = vmatmul.bf16.vlgmr.msra.gmra.mxu1 %v293_v44 }
 0x105   :  { %387 = vmatmul.bf16.vlgmr.msra.gmra.mxu3 %v295_v24 }
 0x114   :  { %382 = vmatmul.bf16.gmra.mxu1 %v294_v45 }
 0x115   :  { %392 = vmatmul.bf16.gmra.mxu3 %v296_v21 }
 0x181   :  { %v378_v47 = vpop.f32.mrf.mxu1 }
 0x182   :  { %v429_v48 = vadd.f32 %v590_v46, %v378_v47 }
 0x184   :  { %437 = vst [vmem:[#allocation8] sm:$0xff] %v429_v48 }
 0x188   :  { %v388_v49 = vpop.f32.mrf.mxu3 }
 0x189   :  { %v380_v50 = vpop.f32.mrf.mxu1  ;;  %v433_v51 = vadd.f32 %v590_v46, %v388_v49 }
 0x18a   :  { %v430_v52 = vadd.f32 %v590_v46, %v380_v50 }
 0x18b   :  { %441 = vst [vmem:[#allocation8 + $0x20] sm:$0xff] %v433_v51 }
 0x18c   :  { %438 = vst [vmem:[#allocation8 + $0x8] sm:$0xff] %v430_v52 }
 0x190   :  { %v390_v53 = vpop.f32.mrf.mxu3 }
 0x191   :  { %v383_v54 = vpop.f32.mrf.mxu1  ;;  %v434_v55 = vadd.f32 %v590_v46, %v390_v53 }
 0x192   :  { %v431_v56 = vadd.f32 %v590_v46, %v383_v54 }
 0x193   :  { %442 = vst [vmem:[#allocation8 + $0x28] sm:$0xff] %v434_v55 }
 0x194   :  { %439 = vst [vmem:[#allocation8 + $0x10] sm:$0xff] %v431_v56 }
 0x198   :  { %v393_v57 = vpop.f32.mrf.mxu3 }
 0x199   :  { %v385_v58 = vpop.f32.mrf.mxu1  ;;  %v435_v59 = vadd.f32 %v590_v46, %v393_v57 }
 0x19a   :  { %v432_v60 = vadd.f32 %v590_v46, %v385_v58 }
 0x19b   :  { %443 = vst [vmem:[#allocation8 + $0x30] sm:$0xff] %v435_v59 }
 0x19c   :  { %440 = vst [vmem:[#allocation8 + $0x18] sm:$0xff] %v432_v60 }
 0x1a0   :  { %v395_v61 = vpop.f32.mrf.mxu3 }
 0x1a1   :  { %v436_v62 = vadd.f32 %v590_v46, %v395_v61 }
 0x1a3   :  { %444 = vst [vmem:[#allocation8 + $0x38] sm:$0xff] %v436_v62 }
 0x1a4   :  { %457 = dma.vmem_to_hbm [thread:$0]  %s450_s15, 1024, %s452_s18, [#allocation4], %s701_s19, %s701_s19, %s702_s20  }
 0x1a5   :  { %693 = dma.done.wait [#allocation4], 1024  }
 0x1a6   :  { %694 = vsyncadd [#allocation4], 4294966272 }
 0x1a7   :  { %462 = vsyncpa [#allocation3], 1 }
 0x1a8   :  { %463 = vsyncpa [#allocation6], 1 }
 0x1a9   :  { %464 = vsyncpa [#allocation4], 1 }

</bundles_post_ra>
